<compile_context>
chip_gen: v6e
topology: v6e:2x2x1
jax: 0.10.0
libtpu: 0.0.40
codegen_flags: <defaults>
</compile_context>

<pallas_src>
import jax
import jax.numpy as jnp
from jax.experimental import pallas as pl
from jax.experimental.pallas import tpu as pltpu


def _make_kernel(min_vp, max_vp, vp_top, vp_bottom, top_size, bottom_size, Nb, H, W):
    scale = float(max_vp - min_vp)
    offset = float(min_vp)
    top_val = float(1.0 / (vp_top * vp_top))
    bot_val = float(1.0 / (vp_bottom * vp_bottom))
    Hp = top_size + H + bottom_size

    def kernel(x_ref, o_ref):
        # x_ref block: (Nb, H, W)    -- channel 1 of Nb batch elements (C squeezed)
        # o_ref block: (Nb, W * Hp)  -- lane-dense flat output rows
        v = x_ref[...].astype(jnp.float32) * scale + offset          # (Nb, H, W)
        core = pltpu.einshape("nhw->nwh", v)                          # (Nb, W, H), XLU
        inv = 1.0 / (core * core)                                     # exact pow(-2)

        parts = []
        if top_size > 0:
            parts.append(jnp.full((Nb, W, top_size), top_val, jnp.float32))
        parts.append(inv)
        if bottom_size > 0:
            parts.append(jnp.full((Nb, W, bottom_size), bot_val, jnp.float32))
        tile = jnp.concatenate(parts, axis=-1) if len(parts) > 1 else parts[0]
        tile = tile.astype(o_ref.dtype)                               # (Nb, W, Hp)

        # Scatter the W rows into the dense flat output block.  These are
        # static-offset in-VMEM stores (hidden under DMA); the HBM write-back
        # of o_ref itself is a single lane-dense slab.
        for w in range(W):
            o_ref[:, w * Hp:(w + 1) * Hp] = tile[:, w, :]

    return kernel


def _padded(a, m):
    return -(-a // m) * m


def _tile_bytes(nb, H, W, Hp, itemsize):
    """Conservative per-grid-step VMEM estimate at batch-chunk nb:
    double-buffered, (8,128)-padded in/out blocks plus f32 temporaries."""
    in_t = nb * _padded(H, 8) * _padded(W, 128) * itemsize
    out_t = _padded(nb, 8) * _padded(W * Hp, 128) * itemsize
    temps = 4 * nb * (_padded(H, 8) * _padded(W, 128)          # v
                      + 2 * _padded(W, 8) * _padded(H, 128)    # core, inv
                      + _padded(W, 8) * _padded(Hp, 128))      # tile
    return 2 * (in_t + out_t) + temps


def _choose_nb(N, H, W, Hp, itemsize, budget):
    """Largest batch chunk that fits the VMEM budget; prefers the whole batch,
    then sublane-friendly multiples of 8.  Works with a cdiv grid (no
    divisor-of-N requirement)."""
    fits = lambda nb: _tile_bytes(nb, H, W, Hp, itemsize) <= budget
    if fits(N):
        return N
    for nb in range((N // 8) * 8, 0, -8):
        if fits(nb):
            return nb
    for nb in range(min(N - 1, 7), 0, -1):
        if fits(nb):
            return nb
    # TODO(synk): add an H/W-split tiling path for spatial sizes whose single
    # batch-element tile exceeds the VMEM budget (matters most on v7x 64 MiB).
    return 1


def half_channels_test_forward(
    x_geo,
    *,
    min_vp,
    max_vp,
    vp_top=2.0,
    vp_bottom=2.0,
    top_size=32,
    bottom_size=32,
):
    N, C, H, W = x_geo.shape
    assert C >= 2, "forward indexes channel 1"
    Hp = top_size + H + bottom_size
    itemsize = jnp.dtype(x_geo.dtype).itemsize

    # Generation-aware VMEM budgeting (128 MiB on v5e/v6e, 64 MiB/core on v7x).
    try:
        vmem_cap = int(pltpu.get_tpu_info().vmem_capacity_bytes)
    except Exception:
        vmem_cap = 64 << 20                       # conservative (v7x) fallback
    budget = (vmem_cap * 3) // 8                  # double-buffered tiles + temps
    Nb = _choose_nb(N, H, W, Hp, itemsize, budget)
    num_steps = pl.cdiv(N, Nb)
    # TODO(synk): when num_steps < 2 on a 2-TensorCore part (v7x), add a second
    # parallel grid axis over W (blocks of (W/k)*Hp lanes) to feed both cores.

    needed = _tile_bytes(Nb, H, W, Hp, itemsize)
    vmem_limit = int(min((vmem_cap * 3) // 4,     # leave >= 25% VMEM headroom
                         max(2 * needed, min(32 << 20, (vmem_cap * 3) // 4))))

    kernel = _make_kernel(
        min_vp, max_vp, vp_top, vp_bottom, top_size, bottom_size, Nb, H, W
    )

    cost = pl.CostEstimate(
        flops=4 * N * H * W + N * W * Hp,
        transcendentals=0,
        bytes_accessed=N * H * W * itemsize + N * W * Hp * itemsize,
    )

    out_flat = pl.pallas_call(
        kernel,
        out_shape=jax.ShapeDtypeStruct((N, W * Hp), x_geo.dtype),
        grid_spec=pltpu.PrefetchScalarGridSpec(
            num_scalar_prefetch=0,
            grid=(num_steps,),
            in_specs=[
                # channel 1 of Nb batch elements; C dim squeezed away.
                pl.BlockSpec((Nb, pl.Squeezed(), H, W), lambda n: (n, 1, 0, 0)),
            ],
            # Flat, lane-dense output rows (full W*Hp extent on the lane axis).
            out_specs=pl.BlockSpec((Nb, W * Hp), lambda n: (n, 0)),
        ),
        compiler_params=pltpu.CompilerParams(
            dimension_semantics=("parallel",),
            vmem_limit_bytes=vmem_limit,
        ),
        cost_estimate=cost,
    )(x_geo)

    # Free, contiguous reshape back to the module's output shape.
    out = out_flat.reshape(1, N, W, Hp)
    return out, x_geo


def _reference_forward(x_geo, *, min_vp, max_vp, vp_top, vp_bottom, top_size, bottom_size):
    x = x_geo[:, 1, :, :] * (max_vp - min_vp) + min_vp          # (N, H, W)
    x = jnp.pad(x, ((0, 0), (top_size, 0), (0, 0)), constant_values=vp_top)
    x = jnp.pad(x, ((0, 0), (0, bottom_size), (0, 0)), constant_values=vp_bottom)
    x = jnp.transpose(x, (0, 2, 1))[None]                       # (1, N, W, Hp)
    return 1.0 / (x * x), x_geo


if __name__ == "__main__":
    key = jax.random.PRNGKey(0)
    N, C, H, W = 2, 4, 16, 16
    x_geo = jax.random.uniform(key, (N, C, H, W), dtype=jnp.float32)

    params = dict(min_vp=1.5, max_vp=4.5, vp_top=2.0, vp_bottom=2.0,
                  top_size=32, bottom_size=32)

    out, x_geo_out = half_channels_test_forward(x_geo, **params)
    out = jax.block_until_ready(out)

    ref_out, ref_geo = _reference_forward(x_geo, **params)
    Hp = params["top_size"] + H + params["bottom_size"]
    assert out.shape == (1, N, W, Hp)
    assert jnp.allclose(out, ref_out, rtol=1e-6, atol=1e-6)
    assert jnp.array_equal(x_geo_out, ref_geo)

    print("KERNEL_OK")
</pallas_src>

<mosaic_0001>
module attributes {stable_mosaic.version = 11 : i64} {
  func.func @kernel(%arg0: i32, %arg1: memref<2x1x16x16xf32, #tpu.memory_space<vmem>>, %arg2: memref<2x1280xf32, #tpu.memory_space<vmem>>) attributes {dimension_semantics = [#tpu.dimension_semantics<parallel>], iteration_bounds = array<i64: 1>, scalar_prefetch = 0 : i64, scratch_operands = 0 : i64, tpu.core_type = #tpu.core_type<tc>, window_params = [{transform_indices = @transform_0, window_bounds = array<i64: 2, 1, 16, 16>}, {transform_indices = @transform_1, window_bounds = array<i64: 2, 1280>}]} {
    %c0 = arith.constant 0 : index
    %c0_0 = arith.constant 0 : index
    %c0_1 = arith.constant 0 : index
    %c0_2 = arith.constant 0 : index
    %0 = vector.load %arg1[%c0, %c0_0, %c0_1, %c0_2] : memref<2x1x16x16xf32, #tpu.memory_space<vmem>>, vector<2x1x16x16xf32>
    %1 = vector.shape_cast %0 : vector<2x1x16x16xf32> to vector<2x16x16xf32>
    %cst = arith.constant 3.000000e+00 : f32
    %2 = vector.broadcast %cst : f32 to vector<2x16x16xf32>
    %3 = arith.mulf %1, %2 : vector<2x16x16xf32>
    %cst_3 = arith.constant 1.500000e+00 : f32
    %4 = vector.broadcast %cst_3 : f32 to vector<2x16x16xf32>
    %5 = arith.addf %3, %4 : vector<2x16x16xf32>
    %6 = tpu.transpose %5, [0, 2, 1] : vector<2x16x16xf32> -> vector<2x16x16xf32>
    %7 = arith.mulf %6, %6 : vector<2x16x16xf32>
    %cst_4 = arith.constant 1.000000e+00 : f32
    %8 = vector.broadcast %cst_4 : f32 to vector<2x16x16xf32>
    %9 = arith.divf %8, %7 : vector<2x16x16xf32>
    %cst_5 = arith.constant 2.500000e-01 : f32
    %10 = vector.broadcast %cst_5 : f32 to vector<2x16x32xf32>
    %cst_6 = arith.constant 2.500000e-01 : f32
    %11 = vector.broadcast %cst_6 : f32 to vector<2x16x32xf32>
    %12 = tpu.concatenate %10, %9, %11 in 2 : vector<2x16x32xf32>, vector<2x16x16xf32>, vector<2x16x32xf32> -> vector<2x16x80xf32>
    %13 = vector.extract_strided_slice %12 {offsets = [0, 0, 0], sizes = [2, 1, 80], strides = [1, 1, 1]} : vector<2x16x80xf32> to vector<2x1x80xf32>
    %14 = vector.shape_cast %13 : vector<2x1x80xf32> to vector<2x80xf32>
    %c0_7 = arith.constant 0 : index
    %c0_8 = arith.constant 0 : index
    %15 = vector.load %arg2[%c0_7, %c0_8] : memref<2x1280xf32, #tpu.memory_space<vmem>>, vector<2x80xf32>
    tpu.vector_store %arg2[%c0_7, %c0_8], %14 {strides = array<i32>} : memref<2x1280xf32, #tpu.memory_space<vmem>>, vector<2x80xf32>,
    %16 = vector.extract_strided_slice %12 {offsets = [0, 1, 0], sizes = [2, 1, 80], strides = [1, 1, 1]} : vector<2x16x80xf32> to vector<2x1x80xf32>
    %17 = vector.shape_cast %16 : vector<2x1x80xf32> to vector<2x80xf32>
    %c0_9 = arith.constant 0 : index
    %c80 = arith.constant 80 : index
    %18 = vector.load %arg2[%c0_9, %c80] : memref<2x1280xf32, #tpu.memory_space<vmem>>, vector<2x80xf32>
    tpu.vector_store %arg2[%c0_9, %c80], %17 {strides = array<i32>} : memref<2x1280xf32, #tpu.memory_space<vmem>>, vector<2x80xf32>,
    %19 = vector.extract_strided_slice %12 {offsets = [0, 2, 0], sizes = [2, 1, 80], strides = [1, 1, 1]} : vector<2x16x80xf32> to vector<2x1x80xf32>
    %20 = vector.shape_cast %19 : vector<2x1x80xf32> to vector<2x80xf32>
    %c0_10 = arith.constant 0 : index
    %c160 = arith.constant 160 : index
    %21 = vector.load %arg2[%c0_10, %c160] : memref<2x1280xf32, #tpu.memory_space<vmem>>, vector<2x80xf32>
    tpu.vector_store %arg2[%c0_10, %c160], %20 {strides = array<i32>} : memref<2x1280xf32, #tpu.memory_space<vmem>>, vector<2x80xf32>,
    %22 = vector.extract_strided_slice %12 {offsets = [0, 3, 0], sizes = [2, 1, 80], strides = [1, 1, 1]} : vector<2x16x80xf32> to vector<2x1x80xf32>
    %23 = vector.shape_cast %22 : vector<2x1x80xf32> to vector<2x80xf32>
    %c0_11 = arith.constant 0 : index
    %c240 = arith.constant 240 : index
    %24 = vector.load %arg2[%c0_11, %c240] : memref<2x1280xf32, #tpu.memory_space<vmem>>, vector<2x80xf32>
    tpu.vector_store %arg2[%c0_11, %c240], %23 {strides = array<i32>} : memref<2x1280xf32, #tpu.memory_space<vmem>>, vector<2x80xf32>,
    %25 = vector.extract_strided_slice %12 {offsets = [0, 4, 0], sizes = [2, 1, 80], strides = [1, 1, 1]} : vector<2x16x80xf32> to vector<2x1x80xf32>
    %26 = vector.shape_cast %25 : vector<2x1x80xf32> to vector<2x80xf32>
    %c0_12 = arith.constant 0 : index
    %c320 = arith.constant 320 : index
    %27 = vector.load %arg2[%c0_12, %c320] : memref<2x1280xf32, #tpu.memory_space<vmem>>, vector<2x80xf32>
    tpu.vector_store %arg2[%c0_12, %c320], %26 {strides = array<i32>} : memref<2x1280xf32, #tpu.memory_space<vmem>>, vector<2x80xf32>,
    %28 = vector.extract_strided_slice %12 {offsets = [0, 5, 0], sizes = [2, 1, 80], strides = [1, 1, 1]} : vector<2x16x80xf32> to vector<2x1x80xf32>
    %29 = vector.shape_cast %28 : vector<2x1x80xf32> to vector<2x80xf32>
    %c0_13 = arith.constant 0 : index
    %c400 = arith.constant 400 : index
    %30 = vector.load %arg2[%c0_13, %c400] : memref<2x1280xf32, #tpu.memory_space<vmem>>, vector<2x80xf32>
    tpu.vector_store %arg2[%c0_13, %c400], %29 {strides = array<i32>} : memref<2x1280xf32, #tpu.memory_space<vmem>>, vector<2x80xf32>,
    %31 = vector.extract_strided_slice %12 {offsets = [0, 6, 0], sizes = [2, 1, 80], strides = [1, 1, 1]} : vector<2x16x80xf32> to vector<2x1x80xf32>
    %32 = vector.shape_cast %31 : vector<2x1x80xf32> to vector<2x80xf32>
    %c0_14 = arith.constant 0 : index
    %c480 = arith.constant 480 : index
    %33 = vector.load %arg2[%c0_14, %c480] : memref<2x1280xf32, #tpu.memory_space<vmem>>, vector<2x80xf32>
    tpu.vector_store %arg2[%c0_14, %c480], %32 {strides = array<i32>} : memref<2x1280xf32, #tpu.memory_space<vmem>>, vector<2x80xf32>,
    %34 = vector.extract_strided_slice %12 {offsets = [0, 7, 0], sizes = [2, 1, 80], strides = [1, 1, 1]} : vector<2x16x80xf32> to vector<2x1x80xf32>
    %35 = vector.shape_cast %34 : vector<2x1x80xf32> to vector<2x80xf32>
    %c0_15 = arith.constant 0 : index
    %c560 = arith.constant 560 : index
    %36 = vector.load %arg2[%c0_15, %c560] : memref<2x1280xf32, #tpu.memory_space<vmem>>, vector<2x80xf32>
    tpu.vector_store %arg2[%c0_15, %c560], %35 {strides = array<i32>} : memref<2x1280xf32, #tpu.memory_space<vmem>>, vector<2x80xf32>,
    %37 = vector.extract_strided_slice %12 {offsets = [0, 8, 0], sizes = [2, 1, 80], strides = [1, 1, 1]} : vector<2x16x80xf32> to vector<2x1x80xf32>
    %38 = vector.shape_cast %37 : vector<2x1x80xf32> to vector<2x80xf32>
    %c0_16 = arith.constant 0 : index
    %c640 = arith.constant 640 : index
    %39 = vector.load %arg2[%c0_16, %c640] : memref<2x1280xf32, #tpu.memory_space<vmem>>, vector<2x80xf32>
    tpu.vector_store %arg2[%c0_16, %c640], %38 {strides = array<i32>} : memref<2x1280xf32, #tpu.memory_space<vmem>>, vector<2x80xf32>,
    %40 = vector.extract_strided_slice %12 {offsets = [0, 9, 0], sizes = [2, 1, 80], strides = [1, 1, 1]} : vector<2x16x80xf32> to vector<2x1x80xf32>
    %41 = vector.shape_cast %40 : vector<2x1x80xf32> to vector<2x80xf32>
    %c0_17 = arith.constant 0 : index
    %c720 = arith.constant 720 : index
    %42 = vector.load %arg2[%c0_17, %c720] : memref<2x1280xf32, #tpu.memory_space<vmem>>, vector<2x80xf32>
    tpu.vector_store %arg2[%c0_17, %c720], %41 {strides = array<i32>} : memref<2x1280xf32, #tpu.memory_space<vmem>>, vector<2x80xf32>,
    %43 = vector.extract_strided_slice %12 {offsets = [0, 10, 0], sizes = [2, 1, 80], strides = [1, 1, 1]} : vector<2x16x80xf32> to vector<2x1x80xf32>
    %44 = vector.shape_cast %43 : vector<2x1x80xf32> to vector<2x80xf32>
    %c0_18 = arith.constant 0 : index
    %c800 = arith.constant 800 : index
    %45 = vector.load %arg2[%c0_18, %c800] : memref<2x1280xf32, #tpu.memory_space<vmem>>, vector<2x80xf32>
    tpu.vector_store %arg2[%c0_18, %c800], %44 {strides = array<i32>} : memref<2x1280xf32, #tpu.memory_space<vmem>>, vector<2x80xf32>,
    %46 = vector.extract_strided_slice %12 {offsets = [0, 11, 0], sizes = [2, 1, 80], strides = [1, 1, 1]} : vector<2x16x80xf32> to vector<2x1x80xf32>
    %47 = vector.shape_cast %46 : vector<2x1x80xf32> to vector<2x80xf32>
    %c0_19 = arith.constant 0 : index
    %c880 = arith.constant 880 : index
    %48 = vector.load %arg2[%c0_19, %c880] : memref<2x1280xf32, #tpu.memory_space<vmem>>, vector<2x80xf32>
    tpu.vector_store %arg2[%c0_19, %c880], %47 {strides = array<i32>} : memref<2x1280xf32, #tpu.memory_space<vmem>>, vector<2x80xf32>,
    %49 = vector.extract_strided_slice %12 {offsets = [0, 12, 0], sizes = [2, 1, 80], strides = [1, 1, 1]} : vector<2x16x80xf32> to vector<2x1x80xf32>
    %50 = vector.shape_cast %49 : vector<2x1x80xf32> to vector<2x80xf32>
    %c0_20 = arith.constant 0 : index
    %c960 = arith.constant 960 : index
    %51 = vector.load %arg2[%c0_20, %c960] : memref<2x1280xf32, #tpu.memory_space<vmem>>, vector<2x80xf32>
    tpu.vector_store %arg2[%c0_20, %c960], %50 {strides = array<i32>} : memref<2x1280xf32, #tpu.memory_space<vmem>>, vector<2x80xf32>,
    %52 = vector.extract_strided_slice %12 {offsets = [0, 13, 0], sizes = [2, 1, 80], strides = [1, 1, 1]} : vector<2x16x80xf32> to vector<2x1x80xf32>
    %53 = vector.shape_cast %52 : vector<2x1x80xf32> to vector<2x80xf32>
    %c0_21 = arith.constant 0 : index
    %c1040 = arith.constant 1040 : index
    %54 = vector.load %arg2[%c0_21, %c1040] : memref<2x1280xf32, #tpu.memory_space<vmem>>, vector<2x80xf32>
    tpu.vector_store %arg2[%c0_21, %c1040], %53 {strides = array<i32>} : memref<2x1280xf32, #tpu.memory_space<vmem>>, vector<2x80xf32>,
    %55 = vector.extract_strided_slice %12 {offsets = [0, 14, 0], sizes = [2, 1, 80], strides = [1, 1, 1]} : vector<2x16x80xf32> to vector<2x1x80xf32>
    %56 = vector.shape_cast %55 : vector<2x1x80xf32> to vector<2x80xf32>
    %c0_22 = arith.constant 0 : index
    %c1120 = arith.constant 1120 : index
    %57 = vector.load %arg2[%c0_22, %c1120] : memref<2x1280xf32, #tpu.memory_space<vmem>>, vector<2x80xf32>
    tpu.vector_store %arg2[%c0_22, %c1120], %56 {strides = array<i32>} : memref<2x1280xf32, #tpu.memory_space<vmem>>, vector<2x80xf32>,
    %58 = vector.extract_strided_slice %12 {offsets = [0, 15, 0], sizes = [2, 1, 80], strides = [1, 1, 1]} : vector<2x16x80xf32> to vector<2x1x80xf32>
    %59 = vector.shape_cast %58 : vector<2x1x80xf32> to vector<2x80xf32>
    %c0_23 = arith.constant 0 : index
    %c1200 = arith.constant 1200 : index
    %60 = vector.load %arg2[%c0_23, %c1200] : memref<2x1280xf32, #tpu.memory_space<vmem>>, vector<2x80xf32>
    tpu.vector_store %arg2[%c0_23, %c1200], %59 {strides = array<i32>} : memref<2x1280xf32, #tpu.memory_space<vmem>>, vector<2x80xf32>,
    return
  }
  func.func @transform_0(%arg0: i32) -> (i32, i32, i32, i32) {
    %c1_i32 = arith.constant 1 : i32
    %c0_i32 = arith.constant 0 : i32
    %c0_i32_0 = arith.constant 0 : i32
    %c0_i32_1 = arith.constant 0 : i32
    return %arg0, %c1_i32, %c0_i32, %c0_i32_0 : i32, i32, i32, i32
  }
  func.func @transform_1(%arg0: i32) -> (i32, i32) {
    %c0_i32 = arith.constant 0 : i32
    %c0_i32_0 = arith.constant 0 : i32
    return %arg0, %c0_i32 : i32, i32
  }
}

</mosaic_0001>

<bundles_post_ra>
// kernel: tpu_custom_call.1
= control target key start
LH: loop header
LB: loop body
LE: loop exit
PB: predicated region body
PF: predicated region fallthrough
CT: control target
= control target key end

     0   :  { %6 = vsyncpa [#allocation3], 0  ;;  %s682_s0 = inlined_call_operand.hbm [shape: f32[2,4,16,16], index: 0, kind: input, shape index: {}]   ;;  %s683_s1 = inlined_call_operand.hbm [shape: f32[2,1280], index: 1, kind: output, shape index: {}]  }
   0x1   :  { %7 = vsyncpa [#allocation4], 0 }
   0x2   :  { %s13_s8 = scalar_lea.hbm %s682_s0, 256  ;;  %s18_s9 = sld [smem:[#allocation0]]  }
   0x3   :  { %s516_s10 = smov [#allocation2]   ;;  %s517_s12 = smov 1024  }
   0x4   :  { %s26_s11 = sshll.u32 %s516_s10, 4  ;;  %33 = sst [smem:[#allocation7]] %s517_s12  ;;  %s27_s11 = int_to_ptr.vmem [resolvable:$true] %s26_s11 }
   0x5   :  { %s518_s13 = smov 256   ;;  %s519_s14 = smov 2  }
   0x6   :  { %35 = sst [smem:[#allocation7 + $0x1]] %s518_s13  ;;  %s520_s16 = smov 128  }
   0x7   :  { %37 = sst [smem:[#allocation7 + $0x2]] %s519_s14  ;;  %s521_s18 = smov 8  }
   0x8   :  { %s464_s15 = sshll.u32 %s18_s9, 26  ;;  %39 = sst [smem:[#allocation7 + $0x3]] %s520_s16 }
   0x9   :  { %s465_s17 = sadd.s32 134217728, %s464_s15  ;;  %41 = sst [smem:[#allocation7 + $0x4]] %s520_s16 }
   0xa   :  { %43 = sst [smem:[#allocation7 + $0x5]] %s521_s18  ;;  %s522_s19 = smov [#allocation3]  }
   0xb   :  { %s523_s20 = smov 131072  }
   0xc   :  { %45 = dma.general %s13_s8, 512, %s27_s11, %s522_s19, %s523_s20, [#allocation7], %s465_s17, 0  }
   0xd   :  { %512 = dma.done.wait [#allocation3], 512  }
   0xe   :  { %513 = vsyncadd [#allocation3], 4294966784  ;;  %v51_v0 = vld [vmem:[#allocation2 + $0x10] sm:$0xff]  ;;  %v49_v1 = vld [vmem:[#allocation2] sm:$0xff]  ;;  %s524_s0 = smov 32   ;;  %v168_v26 = vlaneseq  ;;  %vm153_vm0 = vcmask 261120  }
   0xf   :  { %v52_v2 = vld [vmem:[#allocation2 + $0x18] sm:$0xff]  ;;  %v55_v3 = vmul.f32 3.0, %v51_v0  ;;  %v53_v4 = vmul.f32 3.0, %v49_v1  ;;  %v50_v6 = vld [vmem:[#allocation2 + $0x8] sm:$0xff]  ;;  %v525_v24 = vmov 1983009808  }
  0x10   :  { %v56_v5 = vmul.f32 3.0, %v52_v2  ;;  %v54_v7 = vmul.f32 3.0, %v50_v6  ;;  %v166_v25 = vunpack.c.l.s4 %v525_v24  ;;  %v169_v28 = vshrl.u32 %v168_v26, 7  ;;  %s526_s21 = smov 80   ;;  %s527_s22 = smov 112  }
  0x11   :  { %v59_v8 = vadd.f32 1.5, %v55_v3  ;;  %v57_v9 = vadd.f32 1.5, %v53_v4  ;;  %vm158_vm1 = vcmask 392192   ;;  %vm184_vm2 = vcmask 1041409   ;;  %s528_s23 = smov 64   ;;  %s529_s24 = smov 16  }
  0x12   :  { %v60_v10 = vadd.f32 1.5, %v56_v5  ;;  %v58_v11 = vadd.f32 1.5, %v54_v7  ;;  %v167_v27 = vunpack.c.0.s8 %v166_v25  ;;  %vm186_vm3 = vcmask 1043459   ;;  %s530_s25 = smov 96   ;;  %s531_s26 = smov 48  }
  0x13   :  { %93 = vxpose.xlu1.b32.start [1/2] (short) (narrow) %v59_v8, 16  ;;  %61 = vxpose.xlu0.b32.start [1/2] (short) (narrow) %v57_v9, 16  ;;  %vm188_vm4 = vcmask 1045509   ;;  %vm190_vm5 = vcmask 1047559   ;;  %vm193_vm6 = vcmask 648192   ;;  %vm208_vm7 = vcmask 1042048  }
  0x14   :  { %v170_v29 = vsub.s32 %v167_v27, %v169_v28  ;;  %vm209_vm8 = vcmask 257026   ;;  %vm205_vm9 = vcmask 654336   ;;  %vm239_vm11 = vcmask 1042304   ;;  %s532_s27 = smov [#allocation5]  }
  0x15   :  { %vm210_vm10 = vmor %vm209_vm8, %vm208_vm7  ;;  %vm240_vm12 = vcmask 519170   ;;  %vm272_vm13 = vcmask 1041920   ;;  %vm273_vm14 = vcmask 125954   ;;  %vm236_vm15 = vcmask 916480   ;;  %s455_s28 = sshll.u32 %s532_s27, 4  ;;  %s456_s28 = int_to_ptr.vmem [resolvable:$true] %s455_s28 }
  0x16   :  { %vm300_vm7 = vcmask 785408   ;;  %s492_s29 = scalar_lea.vmem %s456_s28, 320  ;;  %p497_p1 = scmp.lt.s32.totalorder %s456_s28, %s456_s28 }
  0x17   :  { %94 = vxpose.xlu1.b32.end [2/2] (short) (narrow) %v60_v10, 16  ;;  %62 = vxpose.xlu0.b32.end [2/2] (short) (narrow) %v58_v11, 16  ;;  %p493_p0 = scmp.ne.s32.totalorder %s456_s28, %s492_s29  ;;  %p498_p2 = scmp.lt.s32.totalorder %s492_s29, %s492_s29 }
  0x19   :  { %p499_p3 = por %p498_p2, %p497_p1 }
  0x1b   :  { %p500_p4 = pnand %p499_p3, %p493_p0 }
  0x8f   :  { %v109_v12 = vpop.trf.xlu1  ;;  %v77_v13 = vpop.trf.xlu0 }
  0x90   :  { %v127_v14 = vmul.f32 %v109_v12, %v109_v12  ;;  %v125_v15 = vmul.f32 %v77_v13, %v77_v13 }
  0x92   :  { %484 = vrcp.f32 %v127_v14 }
  0x93   :  { %486 = vrcp.f32 %v125_v15  ;;  %v78_v16 = vpop.trf.xlu0  ;;  %v110_v17 = vpop.trf.xlu1 }
  0x94   :  { %v126_v18 = vmul.f32 %v78_v16, %v78_v16  ;;  %v128_v19 = vmul.f32 %v110_v17, %v110_v17 }
  0x96   :  { %488 = vrcp.f32 %v126_v18 }
  0x97   :  { %490 = vrcp.f32 %v128_v19 }
  0x9f   :  { %v485_v20 = vpop.eup %484 }
  0xa0   :  { %v487_v21 = vpop.eup %486  ;;  %145 = vrot.lane.b32.xlu1 %v485_v20, %s524_s0 }
  0xa1   :  { %141 = vrot.lane.b32.xlu0 %v487_v21, %s524_s0 }
  0xa3   :  { %v489_v22 = vpop.eup %488 }
  0xa4   :  { %143 = vrot.lane.b32.xlu1 %v489_v22, %s524_s0  ;;  %v491_v23 = vpop.eup %490 }
  0xa8   :  { %147 = vrot.lane.b32.xlu1 %v491_v23, %s524_s0 }
 0x112   :  { %v146_v30 = vpop.permute.xlu1 %145 }
 0x113   :  { %v156_v31 = vsel %vm153_vm0, 0.25, %v146_v30  ;;  %v142_v32 = vpop.permute.xlu0 %141 }
 0x114   :  { %v161_v33 = vsel %vm158_vm1, %v156_v31, 0.25  ;;  %v154_v34 = vsel %vm153_vm0, 0.25, %v142_v32 }
 0x115   :  { %v178_v35 = vrot.slane %v161_v33, %v170_v29  ;;  %v251_v36 = vcombine.high %v161_v33, %v161_v33  ;;  %v159_v37 = vsel %vm158_vm1, %v154_v34, 0.25 }
 0x116   :  { %v171_v38 = vrot.slane %v159_v37, %v170_v29  ;;  %v144_v39 = vpop.permute.xlu1 %143  ;;  %v243_v46 = vcombine.high %v159_v37, %v159_v37 }
 0x117   :  { %v554_v40 = vrot.slane %v251_v36, %v170_v29  ;;  %v556_v41 = vrot.slane %v178_v35, 7  ;;  %v155_v42 = vsel %vm153_vm0, 0.25, %v144_v39  ;;  %v213_v50 = vcombine.high %v178_v35, %v178_v35 }
 0x118   :  { %v195_v43 = vrot.slane %v171_v38, 1  ;;  %v212_v44 = vcombine.high %v171_v38, %v171_v38  ;;  %v160_v45 = vsel %vm158_vm1, %v155_v42, 0.25  ;;  %v250_v57 = vrot.slane %v243_v46, %v170_v29 }
 0x119   :  { %v560_v47 = vrot.slane %v160_v45, %v170_v29  ;;  %v185_v51 = vsel %vm184_vm2, %v556_v41, %v171_v38  ;;  %v261_v52 = vrot.slane %v554_v40, 7  ;;  %v383_v59 = vcombine.high %v160_v45, %v160_v45 }
 0x11a   :  { %v226_v48 = vrot.slane %v212_v44, 1  ;;  %v148_v49 = vpop.permute.xlu1 %147  ;;  %v198_v55 = vsel %vm184_vm2, %v178_v35, %v195_v43  ;;  %v187_v1 = vsel %vm186_vm3, %v556_v41, %v185_v51  ;;  %v216_v11 = vrot.slane %v213_v50, 7 }
 0x11b   :  { %v357_v53 = vcombine.high %v560_v47, %v560_v47  ;;  %v157_v54 = vsel %vm153_vm0, 0.25, %v148_v49  ;;  %v344_v58 = vrot.slane %v560_v47, 1  ;;  %v199_v63 = vsel %vm186_vm3, %v178_v35, %v198_v55 }
 0x11c   :  { %v229_v56 = vsel %vm184_vm2, %v213_v50, %v226_v48  ;;  %v162_v60 = vsel %vm158_vm1, %v157_v54, 0.25  ;;  %v200_v2 = vsel %vm188_vm4, %v178_v35, %v199_v63  ;;  %v262_v3 = vsel %vm184_vm2, %v261_v52, %v250_v57 }
 0x11d   :  { %v572_v61 = vrot.slane %v162_v60, %v170_v29  ;;  %v391_v62 = vcombine.high %v162_v60, %v162_v60  ;;  %v230_v0 = vsel %vm186_vm3, %v213_v50, %v229_v56  ;;  %v370_v4 = vrot.slane %v357_v53, 1 }
 0x11e   :  { %v201_v6 = vsel %vm190_vm5, %v178_v35, %v200_v2  ;;  %v231_v8 = vsel %vm188_vm4, %v213_v50, %v230_v0  ;;  %v390_v12 = vrot.slane %v383_v59, %v170_v29  ;;  %v263_v14 = vsel %vm186_vm3, %v261_v52, %v262_v3 }
 0x11f   :  { %v580_v5 = vrot.slane %v391_v62, %v170_v29  ;;  %v347_v7 = vsel %vm184_vm2, %v572_v61, %v344_v58  ;;  %202 = vrot.lane.b32.xlu1 %v201_v6, %s526_s21  ;;  %v358_v10 = vcombine.high %v572_v61, %v572_v61  ;;  %v276_v16 = vrot.slane %v250_v57, 1 }
 0x120   :  { %v348_v9 = vsel %vm186_vm3, %v572_v61, %v347_v7  ;;  %v217_v19 = vsel %vm184_vm2, %v216_v11, %v212_v44  ;;  %v232_v20 = vsel %vm190_vm5, %v213_v50, %v231_v8  ;;  %v189_v23 = vsel %vm188_vm4, %v556_v41, %v187_v1 }
 0x121   :  { %v349_v13 = vsel %vm188_vm4, %v572_v61, %v348_v9  ;;  %v401_v15 = vrot.slane %v580_v5, 7  ;;  %v373_v18 = vsel %vm184_vm2, %v358_v10, %v370_v4  ;;  %v264_v24 = vsel %vm188_vm4, %v261_v52, %v263_v14 }
 0x122   :  { %v350_v17 = vsel %vm190_vm5, %v572_v61, %v349_v13  ;;  %v374_v21 = vsel %vm186_vm3, %v358_v10, %v373_v18  ;;  %v288_v27 = vcombine.high %v250_v57, %v250_v57  ;;  %v412_v28 = vrot.slane %v390_v12, 1 }
 0x123   :  { %351 = vrot.lane.b32.xlu0 %v350_v17, %s526_s21  ;;  %v402_v22 = vsel %vm184_vm2, %v401_v15, %v390_v12  ;;  %233 = vrot.lane.b32.xlu1 %v232_v20, %s527_s22  ;;  %v375_v25 = vsel %vm188_vm4, %v358_v10, %v374_v21  ;;  %v218_v29 = vsel %vm186_vm3, %v216_v11, %v217_v19  ;;  %v361_v32 = vrot.slane %v358_v10, 7 }
 0x124   :  { %v403_v26 = vsel %vm186_vm3, %v401_v15, %v402_v22  ;;  %v376_v30 = vsel %vm190_vm5, %v358_v10, %v375_v25  ;;  %v279_v31 = vsel %vm184_vm2, %v554_v40, %v276_v16  ;;  %v289_v33 = vcombine.high %v554_v40, %v554_v40 }
 0x125   :  { %v265_v34 = vsel %vm190_vm5, %v261_v52, %v264_v24  ;;  %v404_v35 = vsel %vm188_vm4, %v401_v15, %v403_v26  ;;  %v424_v36 = vcombine.high %v580_v5, %v580_v5  ;;  %v191_v37 = vsel %vm190_vm5, %v556_v41, %v189_v23 }
 0x126   :  { %v219_v38 = vsel %vm188_vm4, %v216_v11, %v218_v29  ;;  %v362_v39 = vsel %vm184_vm2, %v361_v32, %v357_v53  ;;  %v292_v42 = vrot.slane %v289_v33, 7  ;;  %194 = vst.msk [vmem:[#allocation5] sm:$0x3] %vm193_vm6, %v191_v37  ;;  %v280_v43 = vsel %vm186_vm3, %v554_v40, %v279_v31 }
 0x127   :  { %377 = vrot.lane.b32.xlu0 %v376_v30, %s527_s22  ;;  %266 = vrot.lane.b32.xlu1 %v265_v34, %s528_s23  ;;  %v363_v44 = vsel %vm186_vm3, %v361_v32, %v362_v39  ;;  %v415_v45 = vsel %vm184_vm2, %v580_v5, %v412_v28  ;;  %v427_v46 = vrot.slane %v424_v36, 7  ;;  %v307_v48 = vrot.slane %v288_v27, 1 }
 0x128   :  { %v405_v41 = vsel %vm190_vm5, %v401_v15, %v404_v35  ;;  %v293_v49 = vsel %vm184_vm2, %v292_v42, %v288_v27  ;;  %v423_v50 = vcombine.high %v390_v12, %v390_v12  ;;  %v220_v51 = vsel %vm190_vm5, %v216_v11, %v219_v38 }
 0x129   :  { %v364_v52 = vsel %vm188_vm4, %v361_v32, %v363_v44  ;;  %v281_v53 = vsel %vm188_vm4, %v554_v40, %v280_v43  ;;  %v416_v54 = vsel %vm186_vm3, %v580_v5, %v415_v45  ;;  %v337_v55 = vrot.slane %v572_v61, 7 }
 0x12a   :  { %v294_v56 = vsel %vm186_vm3, %v292_v42, %v293_v49  ;;  %v428_v57 = vsel %vm184_vm2, %v427_v46, %v423_v50  ;;  %v365_v58 = vsel %vm190_vm5, %v361_v32, %v364_v52  ;;  %v310_v59 = vsel %vm184_vm2, %v289_v33, %v307_v48 }
 0x12b   :  { %406 = vrot.lane.b32.xlu0 %v405_v41, %s528_s23  ;;  %221 = vrot.lane.b32.xlu1 %v220_v51, %s524_s0  ;;  %v338_v60 = vsel %vm184_vm2, %v337_v55, %v560_v47  ;;  %v438_v62 = vrot.slane %v423_v50, 1  ;;  %v282_v63 = vsel %vm190_vm5, %v554_v40, %v281_v53  ;;  %v417_v61 = vsel %vm188_vm4, %v580_v5, %v416_v54 }
 0x12c   :  { %v339_v0 = vsel %vm186_vm3, %v337_v55, %v338_v60  ;;  %v295_v1 = vsel %vm188_vm4, %v292_v42, %v294_v56  ;;  %v429_v2 = vsel %vm186_vm3, %v427_v46, %v428_v57  ;;  %v311_v47 = vsel %vm186_vm3, %v289_v33, %v310_v59 }
 0x12d   :  { %v340_v3 = vsel %vm188_vm4, %v337_v55, %v339_v0  ;;  %v441_v4 = vsel %vm184_vm2, %v424_v36, %v438_v62  ;;  %v418_v6 = vsel %vm190_vm5, %v580_v5, %v417_v61  ;;  %v296_v7 = vsel %vm190_vm5, %v292_v42, %v295_v1  ;;  %vm665_vm2 = vmor %vm240_vm12, %vm239_vm11 }
 0x12e   :  { %v341_v40 = vsel %vm190_vm5, %v337_v55, %v340_v3  ;;  %v430_v8 = vsel %vm188_vm4, %v427_v46, %v429_v2  ;;  %v312_v9 = vsel %vm188_vm4, %v289_v33, %v311_v47  ;;  %v442_v10 = vsel %vm186_vm3, %v424_v36, %v441_v4  ;;  %vm274_vm3 = vmor %vm273_vm14, %vm272_vm13 }
 0x12f   :  { %366 = vrot.lane.b32.xlu0 %v365_v58, %s524_s0  ;;  %283 = vrot.lane.b32.xlu1 %v282_v63, %s529_s24  ;;  %343 = vst.msk [vmem:[#allocation5 + $0xa] sm:$0x3] %vm193_vm6, %v341_v40  ;;  %v431_v11 = vsel %vm190_vm5, %v427_v46, %v430_v8  ;;  %v313_v12 = vsel %vm190_vm5, %v289_v33, %v312_v9  ;;  %vm224_vm0 = vcmask 910592   ;;  %vm269_vm1 = vcmask 523264  }
 0x130   :  { %v443_v5 = vsel %vm188_vm4, %v424_v36, %v442_v10  ;;  %vm286_vm4 = vcmask 779392   ;;  %vm304_vm6 = vcmask 388098  }
 0x131   :  { %v444_v13 = vsel %vm190_vm5, %v424_v36, %v443_v5  ;;  %vm303_vm5 = vcmask 1042176  }
 0x132   :  { %vm305_vm8 = vmor %vm304_vm6, %vm303_vm5 }
 0x133   :  { %419 = vrot.lane.b32.xlu0 %v418_v6, %s529_s24  ;;  %297 = vrot.lane.b32.xlu1 %v296_v7, %s530_s25 }
 0x137   :  { %432 = vrot.lane.b32.xlu0 %v431_v11, %s530_s25  ;;  %314 = vrot.lane.b32.xlu1 %v313_v12, %s531_s26 }
 0x13b   :  { %445 = vrot.lane.b32.xlu0 %v444_v13, %s531_s26 }
 0x191   :  { %v203_v14 = vpop.permute.xlu1 %202 }
 0x192   :  { %v204_v15 = vrot.slane %v203_v14, 6 }
 0x194   :  { %v206_v16 = vsel %vm205_vm9, %v204_v15, %v203_v14 }
 0x195   :  { %v352_v17 = vpop.permute.xlu0 %351  ;;  %211 = vst.msk [vmem:[#allocation5] sm:$0xf] %vm210_vm10, %v206_v16  ;;  %v234_v18 = vpop.permute.xlu1 %233 }
 0x196   :  { %v353_v19 = vrot.slane %v352_v17, 6  ;;  %v235_v23 = vrot.slane %v234_v18, 6 }
 0x198   :  { %v354_v20 = vsel %vm205_vm9, %v353_v19, %v352_v17  ;;  %v237_v29 = vsel %vm236_vm15, %v235_v23, %v234_v18  ;;  %vm317_vm9 = vcmask 1041792  }
 0x199   :  { %356 = vst.msk [vmem:[#allocation5 + $0xa] sm:$0xf] %vm210_vm10, %v354_v20  ;;  %v378_v21 = vpop.permute.xlu0 %377  ;;  %v267_v22 = vpop.permute.xlu1 %266 }
 0x19a   :  { %v268_v24 = vrot.slane %v267_v22, 6  ;;  %v379_v27 = vrot.slane %v378_v21, 6 }
 0x19c   :  { %v270_v31 = vsel %vm269_vm1, %v268_v24, %v267_v22  ;;  %v380_v33 = vsel %vm236_vm15, %v379_v27, %v378_v21 }
 0x19d   :  { %v407_v26 = vpop.permute.xlu0 %406  ;;  %v222_v28 = vpop.permute.xlu1 %221 }
 0x19e   :  { %225 = vst.msk [vmem:[#allocation5 + $0x2] sm:$0x3] %vm224_vm0, %v222_v28  ;;  %v408_v30 = vrot.slane %v407_v26, 6 }
 0x19f   :  { %242 = vst.msk [vmem:[#allocation5 + $0x2] sm:$0xf] %vm665_vm2, %v237_v29 }
 0x1a0   :  { %275 = vst.msk [vmem:[#allocation5 + $0x4] sm:$0xf] %vm274_vm3, %v270_v31  ;;  %v409_v35 = vsel %vm269_vm1, %v408_v30, %v407_v26 }
 0x1a1   :  { %v367_v32 = vpop.permute.xlu0 %366  ;;  %v284_v34 = vpop.permute.xlu1 %283 }
 0x1a2   :  { %369 = vst.msk [vmem:[#allocation5 + $0xc] sm:$0x3] %vm224_vm0, %v367_v32 }
 0x1a3   :  { %287 = vst.msk [vmem:[#allocation5 + $0x6] sm:$0x3] %vm286_vm4, %v284_v34 }
 0x1a4   :  { %382 = vst.msk [vmem:[#allocation5 + $0xc] sm:$0xf] %vm665_vm2, %v380_v33 }
 0x1a5   :  { %411 = vst.msk [vmem:[#allocation5 + $0xe] sm:$0xf] %vm274_vm3, %v409_v35  ;;  %v420_v36 = vpop.permute.xlu0 %419  ;;  %v298_v37 = vpop.permute.xlu1 %297 }
 0x1a6   :  { %422 = vst.msk [vmem:[#allocation5 + $0x10] sm:$0x3] %vm286_vm4, %v420_v36  ;;  %v299_v38 = vrot.slane %v298_v37, 6 }
 0x1a8   :  { %v301_v39 = vsel %vm300_vm7, %v299_v38, %v298_v37 }
 0x1a9   :  { %v433_v42 = vpop.permute.xlu0 %432  ;;  %306 = vst.msk [vmem:[#allocation5 + $0x6] sm:$0xf] %vm305_vm8, %v301_v39  ;;  %v315_v43 = vpop.permute.xlu1 %314 }
 0x1aa   :  { %v434_v44 = vrot.slane %v433_v42, 6  ;;  %318 = vst.msk [vmem:[#allocation5 + $0x8] sm:$0x3] %vm317_vm9, %v315_v43 }
 0x1ac   :  { %v435_v45 = vsel %vm300_vm7, %v434_v44, %v433_v42 }
 0x1ad   :  { %437 = vst.msk [vmem:[#allocation5 + $0x10] sm:$0xf] %vm305_vm8, %v435_v45  ;;  %v446_v46 = vpop.permute.xlu0 %445 }
 0x1ae   :  { %448 = vst.msk [vmem:[#allocation5 + $0x12] sm:$0x3] %vm317_vm9, %v446_v46 }
 0x1af   :  { %503 = shalt.err (!%p500_p4)
}
 0x1b0   :  { %458 = dma.vmem_to_hbm [thread:$0]  %s456_s28, 320, %s683_s1, [#allocation4]  }
 0x1b1   :  { %514 = dma.done.wait [#allocation4], 320  }
 0x1b2   :  { %515 = vsyncadd [#allocation4], 4294966976 }
 0x1b3   :  { %462 = vsyncpa [#allocation3], 1 }
 0x1b4   :  { %463 = vsyncpa [#allocation4], 1 }

</bundles_post_ra>
